<compile_context>
chip_gen: v7x
topology: tpu7x:2x2x1
jax: 0.10.0
libtpu: 0.0.40
codegen_flags: <defaults>
</compile_context>

<pallas_src>
import jax
import jax.numpy as jnp
from jax.experimental import pallas as pl
from jax.experimental.pallas import tpu as pltpu


def _actor_kernel(x_ref, w1_ref, b1_ref, w2_ref, b2_ref, w3_ref, b3_ref,
                  mu_ref):
    # fc1 + tanh  (bf16 matmul inputs, f32 accumulate, f32 bias/tanh)
    h1 = jnp.tanh(
        jnp.dot(x_ref[...].astype(jnp.bfloat16), w1_ref[...],
                preferred_element_type=jnp.float32)
        + b1_ref[...]
    )
    # fc2 + tanh
    h2 = jnp.tanh(
        jnp.dot(h1.astype(jnp.bfloat16), w2_ref[...],
                preferred_element_type=jnp.float32)
        + b2_ref[...]
    )
    # fc3 -> mu
    mu = (
        jnp.dot(h2.astype(jnp.bfloat16), w3_ref[...],
                preferred_element_type=jnp.float32)
        + b3_ref[...]
    )
    mu_ref[...] = mu.astype(mu_ref.dtype)


@jax.jit
def actor_forward(x, w1, b1, w2, b2, w3, b3):
    batch, num_inputs = x.shape
    num_outputs = w3.shape[1]

    # Batch tile: whole batch if small, otherwise 1024-row tiles (a few hundred
    # KiB of VMEM per step regardless of total batch size).
    tb = batch if batch <= 1024 else 1024
    grid = (pl.cdiv(batch, tb),)

    # Weights/biases: constant block index across the grid -> stay resident in
    # VMEM (Pallas skips the re-DMA when the block index is unchanged).
    resident = lambda arr: pl.BlockSpec(arr.shape, lambda i: (0,) * arr.ndim)

    mu = pl.pallas_call(
        _actor_kernel,
        out_shape=jax.ShapeDtypeStruct((batch, num_outputs), jnp.float32),
        grid_spec=pltpu.PrefetchScalarGridSpec(
            num_scalar_prefetch=0,
            grid=grid,
            in_specs=[
                pl.BlockSpec((tb, num_inputs), lambda i: (i, 0)),
                resident(w1), resident(b1),
                resident(w2), resident(b2),
                resident(w3), resident(b3),
            ],
            out_specs=pl.BlockSpec((tb, num_outputs), lambda i: (i, 0)),
        ),
        compiler_params=pltpu.CompilerParams(
            # Batch axis is embarrassingly parallel -> megacore sharding on v7x.
            dimension_semantics=("parallel",),
        ),
    )(x, w1, b1, w2, b2, w3, b3)

    # std = exp(zeros_like(mu)) == ones: compile-time constant, produced in the
    # wrapper instead of burning an output DMA in the kernel.
    std = jnp.ones_like(mu)
    return mu, std


def init_actor_params(key, num_inputs, hidden_size, num_outputs):
    """Deterministic init mirroring nn.Linear default
    (U[-1/sqrt(fan_in), 1/sqrt(fan_in)]), then fc3.weight *= 0.1,
    fc3.bias *= 0.0 — as in the PyTorch module. Weights are returned in bf16
    (single-pass MXU + halved DMA bytes); biases stay f32."""
    ks = jax.random.split(key, 6)

    def linear(kw, kb, fan_in, fan_out):
        bound = 1.0 / jnp.sqrt(float(fan_in))
        # Stored as (in, out) so the kernel does x @ W + b.
        w = jax.random.uniform(kw, (fan_in, fan_out), jnp.float32, -bound, bound)
        b = jax.random.uniform(kb, (1, fan_out), jnp.float32, -bound, bound)
        return w, b

    w1, b1 = linear(ks[0], ks[1], num_inputs, hidden_size)
    w2, b2 = linear(ks[2], ks[3], hidden_size, hidden_size)
    w3, b3 = linear(ks[4], ks[5], hidden_size, num_outputs)
    w3 = w3 * 0.1
    b3 = b3 * 0.0
    return (w1.astype(jnp.bfloat16), b1,
            w2.astype(jnp.bfloat16), b2,
            w3.astype(jnp.bfloat16), b3)


if __name__ == "__main__":
    num_inputs = 32    # observation dim
    hidden_size = 64   # args.hidden_size
    num_outputs = 8    # action dim
    batch = 8

    key = jax.random.PRNGKey(0)
    k_x, k_p = jax.random.split(key)
    x = jax.random.normal(k_x, (batch, num_inputs), jnp.float32)
    params = init_actor_params(k_p, num_inputs, hidden_size, num_outputs)

    mu, std = actor_forward(x, *params)
    jax.block_until_ready((mu, std))

    # Pure-JAX reference (same bf16 operand rounding as the kernel).
    w1, b1, w2, b2, w3, b3 = params
    w1f, w2f, w3f = (w.astype(jnp.float32) for w in (w1, w2, w3))
    xb = x.astype(jnp.bfloat16).astype(jnp.float32)
    h = jnp.tanh(xb @ w1f + b1)
    h = jnp.tanh(h.astype(jnp.bfloat16).astype(jnp.float32) @ w2f + b2)
    mu_ref = h.astype(jnp.bfloat16).astype(jnp.float32) @ w3f + b3
    std_ref = jnp.exp(jnp.zeros_like(mu_ref))

    assert jnp.allclose(mu, mu_ref, atol=1e-3), "mu mismatch (bf16 reference)"
    assert jnp.allclose(std, std_ref), "std mismatch"

    print("KERNEL_OK")
</pallas_src>

<mosaic_0001>
module attributes {stable_mosaic.version = 11 : i64} {
  func.func @_actor_kernel(%arg0: i32, %arg1: memref<8x32xf32, #tpu.memory_space<vmem>>, %arg2: memref<32x64xbf16, #tpu.memory_space<vmem>>, %arg3: memref<1x64xf32, #tpu.memory_space<vmem>>, %arg4: memref<64x64xbf16, #tpu.memory_space<vmem>>, %arg5: memref<1x64xf32, #tpu.memory_space<vmem>>, %arg6: memref<64x8xbf16, #tpu.memory_space<vmem>>, %arg7: memref<1x8xf32, #tpu.memory_space<vmem>>, %arg8: memref<8x8xf32, #tpu.memory_space<vmem>>) attributes {dimension_semantics = [#tpu.dimension_semantics<parallel>], iteration_bounds = array<i64: 1>, scalar_prefetch = 0 : i64, scratch_operands = 0 : i64, tpu.core_type = #tpu.core_type<tc>, window_params = [{transform_indices = @transform_0, window_bounds = array<i64: 8, 32>}, {pipeline_mode = #tpu.pipeline_mode<synchronous>, transform_indices = @transform_1, window_bounds = array<i64: 32, 64>}, {pipeline_mode = #tpu.pipeline_mode<synchronous>, transform_indices = @transform_2, window_bounds = array<i64: 1, 64>}, {pipeline_mode = #tpu.pipeline_mode<synchronous>, transform_indices = @transform_3, window_bounds = array<i64: 64, 64>}, {pipeline_mode = #tpu.pipeline_mode<synchronous>, transform_indices = @transform_4, window_bounds = array<i64: 1, 64>}, {pipeline_mode = #tpu.pipeline_mode<synchronous>, transform_indices = @transform_5, window_bounds = array<i64: 64, 8>}, {pipeline_mode = #tpu.pipeline_mode<synchronous>, transform_indices = @transform_6, window_bounds = array<i64: 1, 8>}, {transform_indices = @transform_7, window_bounds = array<i64: 8, 8>}]} {
    %c0 = arith.constant 0 : index
    %c0_0 = arith.constant 0 : index
    %0 = vector.load %arg1[%c0, %c0_0] : memref<8x32xf32, #tpu.memory_space<vmem>>, vector<8x32xf32>
    %1 = arith.truncf %0 : vector<8x32xf32> to vector<8x32xbf16>
    %c0_1 = arith.constant 0 : index
    %c0_2 = arith.constant 0 : index
    %2 = vector.load %arg2[%c0_1, %c0_2] : memref<32x64xbf16, #tpu.memory_space<vmem>>, vector<32x64xbf16>
    %cst = arith.constant dense<0.000000e+00> : vector<8x64xf32>
    %3 = tpu.matmul %1, %2, %cst {dimension_numbers = #tpu.dot_dimension_numbers<[1], [0], [0], [1], [0, 0, 1, 1], [], []>} : vector<8x32xbf16>, vector<32x64xbf16>, vector<8x64xf32> -> vector<8x64xf32>
    %c0_3 = arith.constant 0 : index
    %c0_4 = arith.constant 0 : index
    %4 = vector.load %arg3[%c0_3, %c0_4] : memref<1x64xf32, #tpu.memory_space<vmem>>, vector<1x64xf32>
    %5 = vector.broadcast %4 : vector<1x64xf32> to vector<8x64xf32>
    %6 = arith.addf %3, %5 : vector<8x64xf32>
    %7 = math.tanh %6 : vector<8x64xf32>
    %8 = arith.truncf %7 : vector<8x64xf32> to vector<8x64xbf16>
    %c0_5 = arith.constant 0 : index
    %c0_6 = arith.constant 0 : index
    %9 = vector.load %arg4[%c0_5, %c0_6] : memref<64x64xbf16, #tpu.memory_space<vmem>>, vector<64x64xbf16>
    %cst_7 = arith.constant dense<0.000000e+00> : vector<8x64xf32>
    %10 = tpu.matmul %8, %9, %cst_7 {dimension_numbers = #tpu.dot_dimension_numbers<[1], [0], [0], [1], [0, 0, 1, 1], [], []>} : vector<8x64xbf16>, vector<64x64xbf16>, vector<8x64xf32> -> vector<8x64xf32>
    %c0_8 = arith.constant 0 : index
    %c0_9 = arith.constant 0 : index
    %11 = vector.load %arg5[%c0_8, %c0_9] : memref<1x64xf32, #tpu.memory_space<vmem>>, vector<1x64xf32>
    %12 = vector.broadcast %11 : vector<1x64xf32> to vector<8x64xf32>
    %13 = arith.addf %10, %12 : vector<8x64xf32>
    %14 = math.tanh %13 : vector<8x64xf32>
    %15 = arith.truncf %14 : vector<8x64xf32> to vector<8x64xbf16>
    %c0_10 = arith.constant 0 : index
    %c0_11 = arith.constant 0 : index
    %16 = vector.load %arg6[%c0_10, %c0_11] : memref<64x8xbf16, #tpu.memory_space<vmem>>, vector<64x8xbf16>
    %cst_12 = arith.constant dense<0.000000e+00> : vector<8x8xf32>
    %17 = tpu.matmul %15, %16, %cst_12 {dimension_numbers = #tpu.dot_dimension_numbers<[1], [0], [0], [1], [0, 0, 1, 1], [], []>} : vector<8x64xbf16>, vector<64x8xbf16>, vector<8x8xf32> -> vector<8x8xf32>
    %c0_13 = arith.constant 0 : index
    %c0_14 = arith.constant 0 : index
    %18 = vector.load %arg7[%c0_13, %c0_14] : memref<1x8xf32, #tpu.memory_space<vmem>>, vector<1x8xf32>
    %19 = vector.broadcast %18 : vector<1x8xf32> to vector<8x8xf32>
    %20 = arith.addf %17, %19 : vector<8x8xf32>
    %c0_15 = arith.constant 0 : index
    %c0_16 = arith.constant 0 : index
    %21 = vector.load %arg8[%c0_15, %c0_16] : memref<8x8xf32, #tpu.memory_space<vmem>>, vector<8x8xf32>
    tpu.vector_store %arg8[%c0_15, %c0_16], %20 {strides = array<i32>} : memref<8x8xf32, #tpu.memory_space<vmem>>, vector<8x8xf32>,
    return
  }
  func.func @transform_0(%arg0: i32) -> (i32, i32) {
    %c0_i32 = arith.constant 0 : i32
    %c0_i32_0 = arith.constant 0 : i32
    return %arg0, %c0_i32 : i32, i32
  }
  func.func @transform_1(%arg0: i32) -> (i32, i32) {
    %c0_i32 = arith.constant 0 : i32
    %c0_i32_0 = arith.constant 0 : i32
    %c0_i32_1 = arith.constant 0 : i32
    return %c0_i32, %c0_i32_0 : i32, i32
  }
  func.func @transform_2(%arg0: i32) -> (i32, i32) {
    %c0_i32 = arith.constant 0 : i32
    %c0_i32_0 = arith.constant 0 : i32
    %c0_i32_1 = arith.constant 0 : i32
    return %c0_i32, %c0_i32_0 : i32, i32
  }
  func.func @transform_3(%arg0: i32) -> (i32, i32) {
    %c0_i32 = arith.constant 0 : i32
    %c0_i32_0 = arith.constant 0 : i32
    %c0_i32_1 = arith.constant 0 : i32
    return %c0_i32, %c0_i32_0 : i32, i32
  }
  func.func @transform_4(%arg0: i32) -> (i32, i32) {
    %c0_i32 = arith.constant 0 : i32
    %c0_i32_0 = arith.constant 0 : i32
    %c0_i32_1 = arith.constant 0 : i32
    return %c0_i32, %c0_i32_0 : i32, i32
  }
  func.func @transform_5(%arg0: i32) -> (i32, i32) {
    %c0_i32 = arith.constant 0 : i32
    %c0_i32_0 = arith.constant 0 : i32
    %c0_i32_1 = arith.constant 0 : i32
    return %c0_i32, %c0_i32_0 : i32, i32
  }
  func.func @transform_6(%arg0: i32) -> (i32, i32) {
    %c0_i32 = arith.constant 0 : i32
    %c0_i32_0 = arith.constant 0 : i32
    %c0_i32_1 = arith.constant 0 : i32
    return %c0_i32, %c0_i32_0 : i32, i32
  }
  func.func @transform_7(%arg0: i32) -> (i32, i32) {
    %c0_i32 = arith.constant 0 : i32
    %c0_i32_0 = arith.constant 0 : i32
    return %arg0, %c0_i32 : i32, i32
  }
}

</mosaic_0001>

<bundles_post_ra>
// kernel: actor_forward.1
= control target key start
LH: loop header
LB: loop body
LE: loop exit
PB: predicated region body
PF: predicated region fallthrough
CT: control target
= control target key end

     0   :  { %12 = vsyncpa [#allocation3], 0  ;;  %s589_s0 = inlined_call_operand.hbm [shape: f32[8,32], index: 0, kind: input, shape index: {}]   ;;  %s590_s1 = inlined_call_operand.hbm [shape: bf16[32,64], index: 1, kind: input, shape index: {}]   ;;  %s591_s2 = inlined_call_operand.vmem [shape: f32[1,64], index: 2, kind: input, shape index: {}]   ;;  %s592_s3 = inlined_call_operand.vmem [shape: bf16[64,64], index: 3, kind: input, shape index: {}]   ;;  %s593_s4 = inlined_call_operand.vmem [shape: f32[1,64], index: 4, kind: input, shape index: {}]   ;;  %s594_s5 = inlined_call_operand.vmem [shape: bf16[64,8], index: 5, kind: input, shape index: {}]   ;;  %s595_s6 = inlined_call_operand.vmem [shape: f32[1,8], index: 6, kind: input, shape index: {}]   ;;  %s596_s7 = inlined_call_operand.hbm [shape: f32[8,8], index: 7, kind: output, shape index: {}]  }
   0x1   :  { %13 = vsyncpa [#allocation6], 0 }
   0x2   :  { %14 = vsyncpa [#allocation4], 0  ;;  %s464_s24 = smov [#allocation2]   ;;  %s465_s26 = smov [#allocation5]  }
   0x3   :  { %s21_s25 = sshll.u32 %s464_s24, 4  ;;  %s30_s27 = sshll.u32 %s465_s26, 4  ;;  %s22_s25 = int_to_ptr.vmem [resolvable:$true] %s21_s25  ;;  %s511_s27 = int_to_ptr.vmem [resolvable:$true] %s30_s27 }
   0x4   :  { %s392_s30 = scalar_lea.hbm %s589_s0, 128 }
   0x5   :  { %p393_p0 = scmp.ne.s32.totalorder %s589_s0, %s392_s30  ;;  %p396_p1 = scmp.lt.u32.totalorder %s392_s30, %s589_s0 }
   0x7   :  { %p398_p2 = pnand %p396_p1, %p393_p0 }
   0x9   :  { %401 = shalt.err (!%p398_p2)
}
   0xa   :  { %s402_s12 = scalar_lea.vmem %s22_s25, 128  ;;  %p407_p4 = scmp.lt.s32.totalorder %s22_s25, %s22_s25 }
   0xb   :  { %p403_p3 = scmp.ne.s32.totalorder %s22_s25, %s402_s12  ;;  %p408_p5 = scmp.lt.s32.totalorder %s402_s12, %s402_s12 }
   0xd   :  { %p409_p6 = por %p408_p5, %p407_p4 }
   0xf   :  { %p410_p7 = pnand %p409_p6, %p403_p3 }
  0x11   :  { %413 = shalt.err (!%p410_p7)
}
  0x12   :  { %24 = dma.hbm_to_vmem [thread:$0]  %s589_s0, 128, %s22_s25, [#allocation3]  }
  0x13   :  { %s414_s17 = scalar_lea.hbm %s590_s1, 256 }
  0x14   :  { %p415_p8 = scmp.ne.s32.totalorder %s590_s1, %s414_s17  ;;  %p418_p9 = scmp.lt.u32.totalorder %s414_s17, %s590_s1 }
  0x16   :  { %p420_p10 = pnand %p418_p9, %p415_p8 }
  0x18   :  { %423 = shalt.err (!%p420_p10)
}
  0x19   :  { %s424_s22 = scalar_lea.vmem %s511_s27, 256  ;;  %p429_p12 = scmp.lt.s32.totalorder %s511_s27, %s511_s27 }
  0x1a   :  { %p425_p11 = scmp.ne.s32.totalorder %s511_s27, %s424_s22  ;;  %p430_p13 = scmp.lt.s32.totalorder %s424_s22, %s424_s22 }
  0x1c   :  { %p431_p0 = por %p430_p13, %p429_p12 }
  0x1e   :  { %p432_p1 = pnand %p431_p0, %p425_p11 }
  0x20   :  { %435 = shalt.err (!%p432_p1)
}
  0x21   :  { %s466_s0 = smov 64   ;;  %s467_s23 = smov 4  }
  0x22   :  { %36 = dma.hbm_to_vmem [thread:$0]  %s590_s1, 256, %s511_s27, [#allocation6], %s466_s0, %s466_s0, %s467_s23  }
  0x23   :  { %458 = dma.done.wait [#allocation3], 128  }
  0x24   :  { %459 = vsyncadd [#allocation3], 4294967168 }
  0x25   :  { %460 = dma.done.wait [#allocation6], 256  }
  0x26   :  { %461 = vsyncadd [#allocation6], 4294967040  ;;  %v468_v0 = vmov 0.0   ;;  %vm469_vm0 = vmmov 0   ;;  %v378_v1 = vld [vmem:[#allocation5] sm:$0xff]   ;;  %v379_v2 = vld [vmem:[#allocation5 + $0x8] sm:$0xff]  }
  0x27   :  { %339 = vmatprep.subr.bf16.mxu0 %v468_v0  ;;  %343 = vmatprep.mubr.msk.bf16.mxu0 %vm469_vm0, %v468_v0  ;;  %v54_v3 = vld [vmem:[#allocation2] sm:$0xff]  ;;  %vm79_vm1 = vcmask 261120   ;;  %v381_v6 = vld [vmem:[%s592_s3 + $0x8] sm:$0xff]   ;;  %v382_v7 = vld [vmem:[%s592_s3 + $0x10] sm:$0xff]   ;;  %vm164_vm2 = vcmask 523264   ;;  %vm292_vm3 = vcmask 64512  }
  0x28   :  { %347 = vmatprep.subr.bf16.mxu1 %v468_v0  ;;  %355 = vmatprep.mubr.msk.bf16.mxu1 %vm469_vm0, %v468_v0  ;;  %v55_v4 = vpack.c.bf16 %v54_v3, %v54_v3  ;;  %v380_v5 = vld [vmem:[%s592_s3] sm:$0xff]   ;;  %v383_v8 = vld [vmem:[%s592_s3 + $0x18] sm:$0xff]   ;;  %v385_v18 = vld [vmem:[%s594_s5 + $0x8] sm:$0xff]  }
  0x29   :  { %340 = vmatpush3.bf16.msra.mxu0 %v378_v1  ;;  %348 = vmatpush3.bf16.msra.mxu1 %v380_v5  ;;  %v310_v9 = vld [vmem:[%s591_s2] ss:$0 sm:$0xff]  ;;  %v386_v19 = vld [vmem:[%s594_s5 + $0x10] sm:$0xff]   ;;  %v387_v20 = vld [vmem:[%s594_s5 + $0x18] sm:$0xff]  }
  0x2a   :  { %341 = vmatprep.subr.bf16.mxu0 %v468_v0  ;;  %349 = vmatprep.subr.bf16.mxu1 %v468_v0  ;;  %v384_v17 = vld [vmem:[%s594_s5] sm:$0xff]   ;;  %s470_s5 = smov [#allocation7]  }
  0x2b   :  { %v314_v21 = vld [vmem:[%s593_s4] ss:$0 sm:$0xff]  ;;  %s300_s22 = sshll.u32 %s470_s5, 4  ;;  %s301_s22 = int_to_ptr.vmem [resolvable:$true] %s300_s22 }
  0x2c   :  { %v320_v29 = vld [vmem:[%s595_s6] ss:$0 sm:$0xff]  ;;  %s436_s4 = scalar_lea.vmem %s301_s22, 128  ;;  %p441_p3 = scmp.lt.s32.totalorder %s301_s22, %s301_s22 }
  0x2d   :  { %342 = vmatpush3.bf16.msra.mxu0 %v379_v2  ;;  %350 = vmatpush3.bf16.msra.mxu1 %v381_v6  ;;  %p437_p2 = scmp.ne.s32.totalorder %s301_s22, %s436_s4  ;;  %p442_p4 = scmp.lt.s32.totalorder %s436_s4, %s436_s4 }
  0x2e   :  { %359 = vmatprep.subr.bf16.mxu0 %v468_v0  ;;  %351 = vmatprep.subr.bf16.mxu1 %v468_v0 }
  0x2f   :  { %p443_p5 = por %p442_p4, %p441_p3 }
  0x30   :  { %344 = vmatmul.mubr.msk.bf16.vlgmr.msra.gmra.mrb[0].mxu0 %vm79_vm1, %v55_v4 }
  0x31   :  { %367 = vmatprep.mubr.msk.bf16.mxu0 %vm469_vm0, %v468_v0  ;;  %352 = vmatpush3.bf16.msra.mxu1 %v382_v7  ;;  %p444_p6 = pnand %p443_p5, %p437_p2 }
  0x32   :  { %353 = vmatprep.subr.bf16.mxu1 %v468_v0  ;;  %360 = vmatpush3.bf16.msra.mxu0 %v384_v17 }
  0x33   :  { %361 = vmatprep.subr.bf16.mxu0 %v468_v0 }
  0x35   :  { %354 = vmatpush3.bf16.msra.mxu1 %v383_v8 }
  0x36   :  { %362 = vmatpush3.bf16.msra.mxu0 %v385_v18 }
  0x37   :  { %363 = vmatprep.subr.bf16.mxu0 %v468_v0 }
  0x3a   :  { %364 = vmatpush3.bf16.msra.mxu0 %v386_v19 }
  0x3b   :  { %365 = vmatprep.subr.bf16.mxu0 %v468_v0 }
  0x3e   :  { %366 = vmatpush3.bf16.msra.mxu0 %v387_v20 }
 0x103   :  { %v117_v10 = vpop.f32.mrb[0].mxu0 }
 0x104   :  { %v118_v11 = vadd.f32 %v310_v9, %v117_v10  ;;  %v345_v12 = vpop.f32.mrb[1].mxu0 }
 0x105   :  { %v120_v13 = vpop.f32.mrb[2].mxu0 }
 0x106   :  { %388 = vtanh.f32 %v118_v11  ;;  %v346_v14 = vpop.f32.mrb[3].mxu0 }
 0x110   :  { %v389_v15 = vpop.eup %388 }
 0x111   :  { %v124_v16 = vpack.c.bf16 %v389_v15, %v389_v15 }
 0x113   :  { %356 = vmatmul.mubr.msk.bf16.vlgmr.msra.gmra.mrb[0].mxu1 %vm164_vm2, %v124_v16 }
 0x1e6   :  { %v202_v22 = vpop.f32.mrb[0].mxu1 }
 0x1e7   :  { %v203_v23 = vadd.f32 %v314_v21, %v202_v22  ;;  %v357_v24 = vpop.f32.mrb[1].mxu1 }
 0x1e8   :  { %v205_v25 = vpop.f32.mrb[2].mxu1 }
 0x1e9   :  { %390 = vtanh.f32 %v203_v23  ;;  %v358_v26 = vpop.f32.mrb[3].mxu1 }
 0x1f3   :  { %v391_v27 = vpop.eup %390 }
 0x1f4   :  { %v209_v28 = vpack.c.bf16 %v391_v27, %v391_v27 }
 0x1f6   :  { %368 = vmatmul.mubr.msk.bf16.vlgmr.msra.gmra.mrb[4].mxu0 %vm164_vm2, %v209_v28 }
 0x2c9   :  { %v286_v30 = vpop.f32.mrb[4].mxu0 }
 0x2ca   :  { %v287_v31 = vadd.f32 %v320_v29, %v286_v30  ;;  %v369_v32 = vpop.f32.mrb[5].mxu0 }
 0x2cb   :  { %v289_v33 = vpop.f32.mrb[6].mxu0 }
 0x2cc   :  { %v370_v34 = vpop.f32.mrb[7].mxu0  ;;  %293 = vst.msk [vmem:[#allocation7] sm:$0xff] %vm292_vm3, %v287_v31 }
 0x2cd   :  { %447 = shalt.err (!%p444_p6)
}
 0x2ce   :  { %s448_s6 = scalar_lea.hbm %s596_s7, 128 }
 0x2cf   :  { %p449_p7 = scmp.ne.s32.totalorder %s596_s7, %s448_s6  ;;  %p452_p8 = scmp.lt.u32.totalorder %s448_s6, %s596_s7 }
 0x2d1   :  { %p454_p9 = pnand %p452_p8, %p449_p7 }
 0x2d3   :  { %457 = shalt.err (!%p454_p9)
}
 0x2d4   :  { %303 = dma.vmem_to_hbm [thread:$0]  %s301_s22, 128, %s596_s7, [#allocation4]  }
 0x2d5   :  { %462 = dma.done.wait [#allocation4], 128  }
 0x2d6   :  { %463 = vsyncadd [#allocation4], 4294967168 }
 0x2d7   :  { %307 = vsyncpa [#allocation3], 1 }
 0x2d8   :  { %308 = vsyncpa [#allocation6], 1 }
 0x2d9   :  { %309 = vsyncpa [#allocation4], 1 }

</bundles_post_ra>
